<compile_context>
chip_gen: v7x
topology: tpu7x:2x2x1
jax: 0.10.0
libtpu: 0.0.40
codegen_flags: <defaults>
</compile_context>

<pallas_src>
import jax
import jax.numpy as jnp
from jax.experimental import pallas as pl
from jax.experimental.pallas import tpu as pltpu


DIMS = [13, 96, 96, 64, 64, 32, 2]   # layer widths of the PyTorch module
PAD = 128                            # lane-aligned padded width for hidden/out dims


def mlp_kernel(x_ref, w1_ref, wslab_ref, bslab_ref, o_ref):
    """One batch tile of the 6-layer MLP, entirely in VMEM.

    x_ref:     (TILE_B, 13)    f32 (or bf16)  current batch tile
    w1_ref:    (13, 128)       bf16  fc1 weight, out-dim zero-padded 96->128
    wslab_ref: (5, 128, 128)   bf16  fc2..fc6 weights, zero-padded to 128x128
    bslab_ref: (6, 128)        f32   all biases, zero-padded to 128
    o_ref:     (TILE_B, 2)     f32   logits
    """
    # In-kernel cast of the input tile (no-op if the caller already gave bf16).
    h = x_ref[...].astype(jnp.bfloat16)

    # layer 1: 13 -> 128 (= 96 padded)
    acc = jnp.dot(h, w1_ref[...], preferred_element_type=jnp.float32)
    acc = jnp.maximum(acc + bslab_ref[0:1, :], 0.0)         # f32 epilogue
    h = acc.astype(jnp.bfloat16)

    # layers 2..6: uniform padded 128x128 MXU tiles (last layer: no ReLU)
    for i in range(5):
        acc = jnp.dot(h, wslab_ref[i], preferred_element_type=jnp.float32)
        acc = acc + bslab_ref[i + 1:i + 2, :]
        if i < 4:
            acc = jnp.maximum(acc, 0.0)
            h = acc.astype(jnp.bfloat16)

    # Only the first 2 lanes are real logits (layer-6 out dim padded 2->128);
    # keep the HBM write narrow to minimize output traffic at large B.
    o_ref[...] = acc[:, :2].astype(o_ref.dtype)


def pack_params(params):
    """Pad + pack the 6 (W, b) pairs into lane-aligned bf16/f32 slabs."""
    w1, b1 = params[0]
    w1p = jnp.zeros((DIMS[0], PAD), jnp.bfloat16).at[:, :DIMS[1]].set(
        w1.astype(jnp.bfloat16))

    wslab = jnp.zeros((5, PAD, PAD), jnp.bfloat16)
    bslab = jnp.zeros((6, PAD), jnp.float32)
    bslab = bslab.at[0, :DIMS[1]].set(b1.reshape(-1).astype(jnp.float32))
    for i in range(1, 6):
        w, b = params[i]
        fin, fout = DIMS[i], DIMS[i + 1]
        wslab = wslab.at[i - 1, :fin, :fout].set(w.astype(jnp.bfloat16))
        bslab = bslab.at[i, :fout].set(b.reshape(-1).astype(jnp.float32))
    return w1p, wslab, bslab


def _round_up(x, m):
    return ((x + m - 1) // m) * m


def classification_model_forward(x, packed, *, tile_b_max=4096):
    """x: [B, 13] float array; packed: output of pack_params. Returns [B, 2] f32."""
    w1p, wslab, bslab = packed
    B = x.shape[0]

    # Batch tile:
    #  * as large as possible (amortize ~0.35 us per grid step),
    #  * but with >= 2 grid steps whenever there is more than one minimal tile
    #    of work, so the ("parallel",) batch axis can be split across v7x's
    #    two TensorCores and the input/output DMA pipeline overlaps compute,
    #  * and capped at tile_b_max (<= 4096) so double-buffered x/out tiles plus
    #    a few live [tb,128] f32/bf16 temps stay far under the 32 MiB scoped
    #    VMEM limit (binding constraint on v7x: 64 MiB per TC).
    tb = min(tile_b_max, _round_up(B, 8))
    if B > 16:  # more than one minimal (8-row) tile of work -> force >= 2 steps
        tb = min(tb, _round_up(pl.cdiv(B, 2), 8))
    grid = (pl.cdiv(B, tb),)

    # Advisory cost hint for XLA's scheduler around the custom call.
    flops = 2 * B * (DIMS[0] * PAD + 5 * PAD * PAD)
    bytes_accessed = (x.size * x.dtype.itemsize            # x stream
                      + B * DIMS[-1] * 4                   # logits
                      + w1p.size * 2 + wslab.size * 2 + bslab.size * 4)
    cost = pl.CostEstimate(flops=flops, transcendentals=0,
                           bytes_accessed=bytes_accessed)

    # No wrapper-side cast/pad: the kernel casts x->bf16 itself and Pallas
    # masks the ragged final block (rows are computed independently, so the
    # unspecified padded rows never affect valid outputs and are not written).
    out = pl.pallas_call(
        mlp_kernel,
        out_shape=jax.ShapeDtypeStruct((B, DIMS[-1]), jnp.float32),
        grid_spec=pltpu.PrefetchScalarGridSpec(
            num_scalar_prefetch=0,
            grid=grid,
            in_specs=[
                pl.BlockSpec((tb, DIMS[0]), lambda i: (i, 0)),     # x tile
                pl.BlockSpec((DIMS[0], PAD), lambda i: (0, 0)),    # fc1 W (resident)
                pl.BlockSpec((5, PAD, PAD), lambda i: (0, 0, 0)),  # fc2..6 W slab
                pl.BlockSpec((6, PAD), lambda i: (0, 0)),          # bias slab
            ],
            out_specs=pl.BlockSpec((tb, DIMS[-1]), lambda i: (i, 0)),
        ),
        compiler_params=pltpu.CompilerParams(
            dimension_semantics=("parallel",),   # shard batch steps across TCs (v7x)
            vmem_limit_bytes=32 * 1024 * 1024,
        ),
        cost_estimate=cost,
    )(x, w1p, wslab, bslab)

    return out


def init_params(key):
    """Deterministic init matching PyTorch nn.Linear default U(-1/sqrt(fan_in), +)."""
    params = []
    for i in range(len(DIMS) - 1):
        fan_in, fan_out = DIMS[i], DIMS[i + 1]
        key, kw, kb = jax.random.split(key, 3)
        bound = 1.0 / jnp.sqrt(float(fan_in))
        w = jax.random.uniform(kw, (fan_in, fan_out), jnp.float32, -bound, bound)
        b = jax.random.uniform(kb, (1, fan_out), jnp.float32, -bound, bound)
        params.append((w, b))
    return params


def reference_forward(x, params):
    """Pure-JAX reference with the same bf16-in / f32-accumulate numerics."""
    h = x.astype(jnp.bfloat16)
    out = None
    for i, (w, b) in enumerate(params):
        acc = jnp.dot(h, w.astype(jnp.bfloat16),
                      preferred_element_type=jnp.float32)
        acc = acc + b.reshape(1, -1).astype(jnp.float32)
        if i < len(params) - 1:
            h = jnp.maximum(acc, 0.0).astype(jnp.bfloat16)
        else:
            out = acc
    return out


if __name__ == "__main__":
    key = jax.random.PRNGKey(0)
    key, kx = jax.random.split(key)

    params = init_params(key)
    packed = pack_params(params)

    # Small demo batches: B=8 exact minimal tile; B=30 exercises the ragged
    # final block (masked output writes) and the >=2-step grid split.
    # At these sizes the run is pure launch overhead; the grid/tiling is there
    # so the same kernel scales to B in the tens of thousands.
    for B in (8, 30):
        x = jax.random.normal(jax.random.fold_in(kx, B), (B, 13), dtype=jnp.float32)
        y = jax.block_until_ready(classification_model_forward(x, packed))
        y_ref = reference_forward(x, params)
        assert y.shape == (B, 2)
        assert jnp.allclose(y, y_ref, atol=1e-2, rtol=1e-2), \
            float(jnp.max(jnp.abs(y - y_ref)))

    print("KERNEL_OK")
</pallas_src>

<mosaic_0001>
module attributes {stable_mosaic.version = 11 : i64} {
  func.func @mlp_kernel(%arg0: i32, %arg1: memref<8x13xf32, #tpu.memory_space<vmem>>, %arg2: memref<13x128xbf16, #tpu.memory_space<vmem>>, %arg3: memref<5x128x128xbf16, #tpu.memory_space<vmem>>, %arg4: memref<6x128xf32, #tpu.memory_space<vmem>>, %arg5: memref<8x2xf32, #tpu.memory_space<vmem>>) attributes {dimension_semantics = [#tpu.dimension_semantics<parallel>], iteration_bounds = array<i64: 1>, scalar_prefetch = 0 : i64, scratch_operands = 0 : i64, tpu.core_type = #tpu.core_type<tc>, window_params = [{transform_indices = @transform_0, window_bounds = array<i64: 8, 13>}, {pipeline_mode = #tpu.pipeline_mode<synchronous>, transform_indices = @transform_1, window_bounds = array<i64: 13, 128>}, {pipeline_mode = #tpu.pipeline_mode<synchronous>, transform_indices = @transform_2, window_bounds = array<i64: 5, 128, 128>}, {pipeline_mode = #tpu.pipeline_mode<synchronous>, transform_indices = @transform_3, window_bounds = array<i64: 6, 128>}, {transform_indices = @transform_4, window_bounds = array<i64: 8, 2>}]} {
    %c0 = arith.constant 0 : index
    %c0_0 = arith.constant 0 : index
    %0 = vector.load %arg1[%c0, %c0_0] : memref<8x13xf32, #tpu.memory_space<vmem>>, vector<8x13xf32>
    %1 = arith.truncf %0 : vector<8x13xf32> to vector<8x13xbf16>
    %c0_1 = arith.constant 0 : index
    %c0_2 = arith.constant 0 : index
    %2 = vector.load %arg2[%c0_1, %c0_2] : memref<13x128xbf16, #tpu.memory_space<vmem>>, vector<13x128xbf16>
    %cst = arith.constant dense<0.000000e+00> : vector<8x128xf32>
    %3 = tpu.matmul %1, %2, %cst {dimension_numbers = #tpu.dot_dimension_numbers<[1], [0], [0], [1], [0, 0, 1, 1], [], []>} : vector<8x13xbf16>, vector<13x128xbf16>, vector<8x128xf32> -> vector<8x128xf32>
    %c0_3 = arith.constant 0 : index
    %c0_4 = arith.constant 0 : index
    %4 = vector.load %arg4[%c0_3, %c0_4] : memref<6x128xf32, #tpu.memory_space<vmem>>, vector<1x128xf32>
    %5 = vector.broadcast %4 : vector<1x128xf32> to vector<8x128xf32>
    %6 = arith.addf %3, %5 : vector<8x128xf32>
    %cst_5 = arith.constant 0.000000e+00 : f32
    %7 = vector.broadcast %cst_5 : f32 to vector<8x128xf32>
    %8 = arith.maximumf %6, %7 : vector<8x128xf32>
    %9 = arith.truncf %8 : vector<8x128xf32> to vector<8x128xbf16>
    %c0_6 = arith.constant 0 : index
    %c0_7 = arith.constant 0 : index
    %c0_8 = arith.constant 0 : index
    %10 = vector.load %arg3[%c0_6, %c0_7, %c0_8] : memref<5x128x128xbf16, #tpu.memory_space<vmem>>, vector<1x128x128xbf16>
    %11 = vector.shape_cast %10 : vector<1x128x128xbf16> to vector<128x128xbf16>
    %cst_9 = arith.constant dense<0.000000e+00> : vector<8x128xf32>
    %12 = tpu.matmul %9, %11, %cst_9 {dimension_numbers = #tpu.dot_dimension_numbers<[1], [0], [0], [1], [0, 0, 1, 1], [], []>} : vector<8x128xbf16>, vector<128x128xbf16>, vector<8x128xf32> -> vector<8x128xf32>
    %c1 = arith.constant 1 : index
    %c0_10 = arith.constant 0 : index
    %13 = vector.load %arg4[%c1, %c0_10] : memref<6x128xf32, #tpu.memory_space<vmem>>, vector<1x128xf32>
    %14 = vector.broadcast %13 : vector<1x128xf32> to vector<8x128xf32>
    %15 = arith.addf %12, %14 : vector<8x128xf32>
    %cst_11 = arith.constant 0.000000e+00 : f32
    %16 = vector.broadcast %cst_11 : f32 to vector<8x128xf32>
    %17 = arith.maximumf %15, %16 : vector<8x128xf32>
    %18 = arith.truncf %17 : vector<8x128xf32> to vector<8x128xbf16>
    %c1_12 = arith.constant 1 : index
    %c0_13 = arith.constant 0 : index
    %c0_14 = arith.constant 0 : index
    %19 = vector.load %arg3[%c1_12, %c0_13, %c0_14] : memref<5x128x128xbf16, #tpu.memory_space<vmem>>, vector<1x128x128xbf16>
    %20 = vector.shape_cast %19 : vector<1x128x128xbf16> to vector<128x128xbf16>
    %cst_15 = arith.constant dense<0.000000e+00> : vector<8x128xf32>
    %21 = tpu.matmul %18, %20, %cst_15 {dimension_numbers = #tpu.dot_dimension_numbers<[1], [0], [0], [1], [0, 0, 1, 1], [], []>} : vector<8x128xbf16>, vector<128x128xbf16>, vector<8x128xf32> -> vector<8x128xf32>
    %c2 = arith.constant 2 : index
    %c0_16 = arith.constant 0 : index
    %22 = vector.load %arg4[%c2, %c0_16] : memref<6x128xf32, #tpu.memory_space<vmem>>, vector<1x128xf32>
    %23 = vector.broadcast %22 : vector<1x128xf32> to vector<8x128xf32>
    %24 = arith.addf %21, %23 : vector<8x128xf32>
    %cst_17 = arith.constant 0.000000e+00 : f32
    %25 = vector.broadcast %cst_17 : f32 to vector<8x128xf32>
    %26 = arith.maximumf %24, %25 : vector<8x128xf32>
    %27 = arith.truncf %26 : vector<8x128xf32> to vector<8x128xbf16>
    %c2_18 = arith.constant 2 : index
    %c0_19 = arith.constant 0 : index
    %c0_20 = arith.constant 0 : index
    %28 = vector.load %arg3[%c2_18, %c0_19, %c0_20] : memref<5x128x128xbf16, #tpu.memory_space<vmem>>, vector<1x128x128xbf16>
    %29 = vector.shape_cast %28 : vector<1x128x128xbf16> to vector<128x128xbf16>
    %cst_21 = arith.constant dense<0.000000e+00> : vector<8x128xf32>
    %30 = tpu.matmul %27, %29, %cst_21 {dimension_numbers = #tpu.dot_dimension_numbers<[1], [0], [0], [1], [0, 0, 1, 1], [], []>} : vector<8x128xbf16>, vector<128x128xbf16>, vector<8x128xf32> -> vector<8x128xf32>
    %c3 = arith.constant 3 : index
    %c0_22 = arith.constant 0 : index
    %31 = vector.load %arg4[%c3, %c0_22] : memref<6x128xf32, #tpu.memory_space<vmem>>, vector<1x128xf32>
    %32 = vector.broadcast %31 : vector<1x128xf32> to vector<8x128xf32>
    %33 = arith.addf %30, %32 : vector<8x128xf32>
    %cst_23 = arith.constant 0.000000e+00 : f32
    %34 = vector.broadcast %cst_23 : f32 to vector<8x128xf32>
    %35 = arith.maximumf %33, %34 : vector<8x128xf32>
    %36 = arith.truncf %35 : vector<8x128xf32> to vector<8x128xbf16>
    %c3_24 = arith.constant 3 : index
    %c0_25 = arith.constant 0 : index
    %c0_26 = arith.constant 0 : index
    %37 = vector.load %arg3[%c3_24, %c0_25, %c0_26] : memref<5x128x128xbf16, #tpu.memory_space<vmem>>, vector<1x128x128xbf16>
    %38 = vector.shape_cast %37 : vector<1x128x128xbf16> to vector<128x128xbf16>
    %cst_27 = arith.constant dense<0.000000e+00> : vector<8x128xf32>
    %39 = tpu.matmul %36, %38, %cst_27 {dimension_numbers = #tpu.dot_dimension_numbers<[1], [0], [0], [1], [0, 0, 1, 1], [], []>} : vector<8x128xbf16>, vector<128x128xbf16>, vector<8x128xf32> -> vector<8x128xf32>
    %c4 = arith.constant 4 : index
    %c0_28 = arith.constant 0 : index
    %40 = vector.load %arg4[%c4, %c0_28] : memref<6x128xf32, #tpu.memory_space<vmem>>, vector<1x128xf32>
    %41 = vector.broadcast %40 : vector<1x128xf32> to vector<8x128xf32>
    %42 = arith.addf %39, %41 : vector<8x128xf32>
    %cst_29 = arith.constant 0.000000e+00 : f32
    %43 = vector.broadcast %cst_29 : f32 to vector<8x128xf32>
    %44 = arith.maximumf %42, %43 : vector<8x128xf32>
    %45 = arith.truncf %44 : vector<8x128xf32> to vector<8x128xbf16>
    %c4_30 = arith.constant 4 : index
    %c0_31 = arith.constant 0 : index
    %c0_32 = arith.constant 0 : index
    %46 = vector.load %arg3[%c4_30, %c0_31, %c0_32] : memref<5x128x128xbf16, #tpu.memory_space<vmem>>, vector<1x128x128xbf16>
    %47 = vector.shape_cast %46 : vector<1x128x128xbf16> to vector<128x128xbf16>
    %cst_33 = arith.constant dense<0.000000e+00> : vector<8x128xf32>
    %48 = tpu.matmul %45, %47, %cst_33 {dimension_numbers = #tpu.dot_dimension_numbers<[1], [0], [0], [1], [0, 0, 1, 1], [], []>} : vector<8x128xbf16>, vector<128x128xbf16>, vector<8x128xf32> -> vector<8x128xf32>
    %c5 = arith.constant 5 : index
    %c0_34 = arith.constant 0 : index
    %49 = vector.load %arg4[%c5, %c0_34] : memref<6x128xf32, #tpu.memory_space<vmem>>, vector<1x128xf32>
    %50 = vector.broadcast %49 : vector<1x128xf32> to vector<8x128xf32>
    %51 = arith.addf %48, %50 : vector<8x128xf32>
    %52 = vector.extract_strided_slice %51 {offsets = [0, 0], sizes = [8, 2], strides = [1, 1]} : vector<8x128xf32> to vector<8x2xf32>
    %c0_35 = arith.constant 0 : index
    %c0_36 = arith.constant 0 : index
    %53 = vector.load %arg5[%c0_35, %c0_36] : memref<8x2xf32, #tpu.memory_space<vmem>>, vector<8x2xf32>
    tpu.vector_store %arg5[%c0_35, %c0_36], %52 {strides = array<i32>} : memref<8x2xf32, #tpu.memory_space<vmem>>, vector<8x2xf32>,
    return
  }
  func.func @transform_0(%arg0: i32) -> (i32, i32) {
    %c0_i32 = arith.constant 0 : i32
    %c0_i32_0 = arith.constant 0 : i32
    return %arg0, %c0_i32 : i32, i32
  }
  func.func @transform_1(%arg0: i32) -> (i32, i32) {
    %c0_i32 = arith.constant 0 : i32
    %c0_i32_0 = arith.constant 0 : i32
    %c0_i32_1 = arith.constant 0 : i32
    return %c0_i32, %c0_i32_0 : i32, i32
  }
  func.func @transform_2(%arg0: i32) -> (i32, i32, i32) {
    %c0_i32 = arith.constant 0 : i32
    %c0_i32_0 = arith.constant 0 : i32
    %c0_i32_1 = arith.constant 0 : i32
    %c0_i32_2 = arith.constant 0 : i32
    return %c0_i32, %c0_i32_0, %c0_i32_1 : i32, i32, i32
  }
  func.func @transform_3(%arg0: i32) -> (i32, i32) {
    %c0_i32 = arith.constant 0 : i32
    %c0_i32_0 = arith.constant 0 : i32
    %c0_i32_1 = arith.constant 0 : i32
    return %c0_i32, %c0_i32_0 : i32, i32
  }
  func.func @transform_4(%arg0: i32) -> (i32, i32) {
    %c0_i32 = arith.constant 0 : i32
    %c0_i32_0 = arith.constant 0 : i32
    return %arg0, %c0_i32 : i32, i32
  }
}

</mosaic_0001>

<bundles_post_ra>
// kernel: tpu_custom_call.1
= control target key start
LH: loop header
LB: loop body
LE: loop exit
PB: predicated region body
PF: predicated region fallthrough
CT: control target
= control target key end

     0   :  { %9 = vsyncpa [#allocation3], 0  ;;  %s1158_s0 = inlined_call_operand.hbm [shape: f32[8,13], index: 0, kind: input, shape index: {}]   ;;  %s1159_s1 = inlined_call_operand.hbm [shape: bf16[13,128], index: 1, kind: input, shape index: {}]   ;;  %s1160_s2 = inlined_call_operand.hbm [shape: bf16[5,128,128], index: 2, kind: input, shape index: {}]   ;;  %s1161_s3 = inlined_call_operand.vmem [shape: f32[6,128], index: 3, kind: input, shape index: {}]   ;;  %s1162_s4 = inlined_call_operand.vmem [shape: f32[8,2], index: 4, kind: output, shape index: {}]  }
   0x1   :  { %10 = vsyncpa [#allocation5], 0  ;;  %s1009_s15 = smov [#allocation4]   ;;  %s939_s19 = scalar_lea.hbm %s1159_s1, 128 }
   0x2   :  { %s26_s16 = sshll.u32 %s1009_s15, 4  ;;  %p940_p0 = scmp.ne.s32.totalorder %s1159_s1, %s939_s19  ;;  %s27_s16 = int_to_ptr.vmem [resolvable:$true] %s26_s16 }
   0x3   :  { %p943_p1 = scmp.lt.u32.totalorder %s939_s19, %s1159_s1 }
   0x5   :  { %p945_p2 = pnand %p943_p1, %p940_p0 }
   0x7   :  { %948 = shalt.err (!%p945_p2)
}
   0x8   :  { %s949_s24 = scalar_lea.vmem %s27_s16, 128  ;;  %p954_p4 = scmp.lt.s32.totalorder %s27_s16, %s27_s16 }
   0x9   :  { %p950_p3 = scmp.ne.s32.totalorder %s27_s16, %s949_s24  ;;  %p955_p5 = scmp.lt.s32.totalorder %s949_s24, %s949_s24 }
   0xb   :  { %p956_p6 = por %p955_p5, %p954_p4 }
   0xd   :  { %p957_p7 = pnand %p956_p6, %p950_p3 }
   0xf   :  { %960 = shalt.err (!%p957_p7)
}
  0x10   :  { %s1010_s25 = smov 64   ;;  %s1011_s26 = smov 4  }
  0x11   :  { %32 = dma.hbm_to_vmem [thread:$0]  %s1159_s1, 128, %s27_s16, [#allocation5], %s1010_s25, %s1010_s25, %s1011_s26  }
  0x12   :  { %s1012_s29 = smov [#allocation2]   ;;  %s1013_s5 = smov [#allocation6]  }
  0x13   :  { %s17_s30 = sshll.u32 %s1012_s29, 4  ;;  %s38_s6 = sshll.u32 %s1013_s5, 4  ;;  %s18_s30 = int_to_ptr.vmem [resolvable:$true] %s17_s30  ;;  %s39_s6 = int_to_ptr.vmem [resolvable:$true] %s38_s6 }
  0x14   :  { %s961_s9 = scalar_lea.hbm %s1158_s0, 128 }
  0x15   :  { %p962_p8 = scmp.ne.s32.totalorder %s1158_s0, %s961_s9  ;;  %p965_p9 = scmp.lt.u32.totalorder %s961_s9, %s1158_s0 }
  0x17   :  { %p967_p10 = pnand %p965_p9, %p962_p8 }
  0x19   :  { %970 = shalt.err (!%p967_p10)
}
  0x1a   :  { %s971_s1 = scalar_lea.vmem %s18_s30, 128  ;;  %p976_p12 = scmp.lt.s32.totalorder %s18_s30, %s18_s30 }
  0x1b   :  { %p972_p11 = scmp.ne.s32.totalorder %s18_s30, %s971_s1  ;;  %p977_p13 = scmp.lt.s32.totalorder %s971_s1, %s971_s1 }
  0x1d   :  { %p978_p0 = por %p977_p13, %p976_p12 }
  0x1f   :  { %p979_p1 = pnand %p978_p0, %p972_p11 }
  0x21   :  { %982 = shalt.err (!%p979_p1)
}
  0x22   :  { %20 = dma.hbm_to_vmem [thread:$0]  %s1158_s0, 128, %s18_s30, [#allocation3]  }
  0x23   :  { %s983_s18 = scalar_lea.hbm %s1160_s2, 5120 }
  0x24   :  { %p984_p2 = scmp.ne.s32.totalorder %s1160_s2, %s983_s18  ;;  %p987_p3 = scmp.lt.u32.totalorder %s983_s18, %s1160_s2 }
  0x26   :  { %p989_p4 = pnand %p987_p3, %p984_p2 }
  0x28   :  { %992 = shalt.err (!%p989_p4)
}
  0x29   :  { %s993_s23 = scalar_lea.vmem %s39_s6, 5120  ;;  %p998_p6 = scmp.lt.s32.totalorder %s39_s6, %s39_s6 }
  0x2a   :  { %p994_p5 = scmp.ne.s32.totalorder %s39_s6, %s993_s23  ;;  %p999_p7 = scmp.lt.s32.totalorder %s993_s23, %s993_s23 }
  0x2c   :  { %p1000_p8 = por %p999_p7, %p998_p6 }
  0x2e   :  { %p1001_p9 = pnand %p1000_p8, %p994_p5 }
  0x30   :  { %1004 = shalt.err (!%p1001_p9)
}
  0x31   :  { %44 = dma.hbm_to_vmem [thread:$0]  %s1160_s2, 5120, %s39_s6, [#allocation5], %s1010_s25, %s1010_s25, %s1011_s26  }
  0x32   :  { %1005 = dma.done.wait [#allocation3], 128  }
  0x33   :  { %1006 = vsyncadd [#allocation3], 4294967168 }
  0x34   :  { %1007 = dma.done.wait [#allocation5], 5248  }
  0x35   :  { %1008 = vsyncadd [#allocation5], 4294962048  ;;  %vm75_vm0 = vcmask 1045504   ;;  %v1014_v0 = vmov 0.0   ;;  %vm1015_vm1 = vmmov 0   ;;  %vm76_vm2 = vcmask 1046528  }
  0x36   :  { %784 = vmatprep.subr.bf16.mxu0 %v1014_v0  ;;  %790 = vmatprep.subr.bf16.mxu1 %v1014_v0  ;;  %v1016_v1 = vmov 65535   ;;  %v898_v4 = vld [vmem:[#allocation4] sm:$0x7f]   ;;  %v57_v5 = vld [vmem:[#allocation2] sm:$0xff]  ;;  %v899_v7 = vld [vmem:[#allocation6] sm:$0xff]   ;;  %vm71_vm3 = vcmask 105472  }
  0x37   :  { %786 = vmatprep.mubr.msk.bf16.mxu0 %vm1015_vm1, %v1014_v0  ;;  %806 = vmatprep.mubr.msk.bf16.mxu1 %vm1015_vm1, %v1014_v0  ;;  %v77_v2 = vsel %vm75_vm0, 4294967295, %v1016_v1  ;;  %v58_v8 = vpack.c.bf16 %v57_v5, %v57_v5  ;;  %v900_v9 = vld [vmem:[#allocation6 + $0x8] sm:$0xff]   ;;  %v901_v10 = vld [vmem:[#allocation6 + $0x10] sm:$0xff]   ;;  %v902_v11 = vld [vmem:[#allocation6 + $0x18] sm:$0xff]   ;;  %vm681_vm4 = vcmask 15360  }
  0x38   :  { %v78_v3 = vsel %vm76_vm2, %v77_v2, 0  ;;  %791 = vmatpush3.bf16.msra.mxu1 %v899_v7  ;;  %v903_v12 = vld [vmem:[#allocation6 + $0x20] sm:$0xff]   ;;  %v904_v13 = vld [vmem:[#allocation6 + $0x28] sm:$0xff]   ;;  %v905_v14 = vld [vmem:[#allocation6 + $0x30] sm:$0xff]  }
  0x39   :  { %v80_v6 = vand.u32 %v898_v4, %v78_v3  ;;  %792 = vmatprep.subr.bf16.mxu1 %v1014_v0  ;;  %v906_v15 = vld [vmem:[#allocation6 + $0x38] sm:$0xff]   ;;  %v907_v16 = vld [vmem:[#allocation6 + $0x40] sm:$0xff]   ;;  %v908_v17 = vld [vmem:[#allocation6 + $0x48] sm:$0xff]  }
  0x3a   :  { %v909_v18 = vld [vmem:[#allocation6 + $0x50] sm:$0xff]   ;;  %v910_v19 = vld [vmem:[#allocation6 + $0x58] sm:$0xff]   ;;  %v911_v20 = vld [vmem:[#allocation6 + $0x60] sm:$0xff]  }
  0x3b   :  { %785 = vmatpush3.bf16.msra.mxu0 %v80_v6  ;;  %v912_v21 = vld [vmem:[#allocation6 + $0x68] sm:$0xff]   ;;  %v913_v30 = vld [vmem:[#allocation6 + $0x70] sm:$0xff]   ;;  %v914_v31 = vld [vmem:[#allocation6 + $0x78] sm:$0xff]  }
  0x3c   :  { %810 = vmatprep.subr.bf16.mxu0 %v1014_v0  ;;  %793 = vmatpush3.bf16.msra.mxu1 %v900_v9  ;;  %v689_v22 = vld [vmem:[%s1161_s3] ss:$0 sm:$0xff]  ;;  %v915_v32 = vld [vmem:[#allocation6 + $0x80] sm:$0xff]   ;;  %v917_v34 = vld [vmem:[#allocation6 + $0x90] sm:$0xff]  }
  0x3d   :  { %794 = vmatprep.subr.bf16.mxu1 %v1014_v0  ;;  %v916_v33 = vld [vmem:[#allocation6 + $0x88] sm:$0xff]   ;;  %v918_v35 = vld [vmem:[#allocation6 + $0x98] sm:$0xff]   ;;  %v919_v36 = vld [vmem:[#allocation6 + $0xa0] sm:$0xff]  }
  0x3e   :  { %787 = vmatmul.mubr.msk.bf16.vlgmr.msra.gmra.mrb[0].mxu0 %vm71_vm3, %v58_v8  ;;  %v920_v37 = vld [vmem:[#allocation6 + $0xa8] sm:$0xff]   ;;  %v921_v46 = vld [vmem:[#allocation6 + $0xb0] sm:$0xff]   ;;  %v922_v47 = vld [vmem:[#allocation6 + $0xb8] sm:$0xff]  }
  0x3f   :  { %826 = vmatprep.mubr.msk.bf16.mxu0 %vm1015_vm1, %v1014_v0  ;;  %811 = vmatpush3.bf16.msra.mxu0 %v907_v16  ;;  %v692_v38 = vld [vmem:[%s1161_s3 + $0x1] ss:$0 sm:$0xff]  ;;  %v923_v48 = vld [vmem:[#allocation6 + $0xc0] sm:$0xff]   ;;  %v925_v50 = vld [vmem:[#allocation6 + $0xd0] sm:$0xff]  }
  0x40   :  { %795 = vmatpush3.bf16.msra.mxu1 %v901_v10  ;;  %812 = vmatprep.subr.bf16.mxu0 %v1014_v0  ;;  %v924_v49 = vld [vmem:[#allocation6 + $0xc8] sm:$0xff]   ;;  %v926_v51 = vld [vmem:[#allocation6 + $0xd8] sm:$0xff]   ;;  %v927_v52 = vld [vmem:[#allocation6 + $0xe0] sm:$0xff]  }
  0x41   :  { %796 = vmatprep.subr.bf16.mxu1 %v1014_v0  ;;  %v928_v53 = vld [vmem:[#allocation6 + $0xe8] sm:$0xff]   ;;  %v929_v62 = vld [vmem:[#allocation6 + $0xf0] sm:$0xff]   ;;  %v930_v63 = vld [vmem:[#allocation6 + $0xf8] sm:$0xff]  }
  0x42   :  { %v701_v54 = vld [vmem:[%s1161_s3 + $0x2] ss:$0 sm:$0xff]  ;;  %v931_v1 = vld [vmem:[#allocation6 + $0x100] sm:$0xff]   ;;  %v933_v3 = vld [vmem:[#allocation6 + $0x110] sm:$0xff]  }
  0x43   :  { %813 = vmatpush3.bf16.msra.mxu0 %v908_v17  ;;  %v932_v2 = vld [vmem:[#allocation6 + $0x108] sm:$0xff]   ;;  %v934_v4 = vld [vmem:[#allocation6 + $0x118] sm:$0xff]   ;;  %v935_v5 = vld [vmem:[#allocation6 + $0x120] sm:$0xff]  }
  0x44   :  { %797 = vmatpush3.bf16.msra.mxu1 %v902_v11  ;;  %814 = vmatprep.subr.bf16.mxu0 %v1014_v0  ;;  %v936_v6 = vld [vmem:[#allocation6 + $0x128] sm:$0xff]   ;;  %v938_v16 = vld [vmem:[#allocation6 + $0x138] sm:$0xff]  }
  0x45   :  { %798 = vmatprep.subr.bf16.mxu1 %v1014_v0  ;;  %v710_v7 = vld [vmem:[%s1161_s3 + $0x3] ss:$0 sm:$0xff]  ;;  %v719_v17 = vld [vmem:[%s1161_s3 + $0x4] ss:$0 sm:$0xff] }
  0x47   :  { %815 = vmatpush3.bf16.msra.mxu0 %v909_v18 }
  0x48   :  { %799 = vmatpush3.bf16.msra.mxu1 %v903_v12  ;;  %816 = vmatprep.subr.bf16.mxu0 %v1014_v0 }
  0x49   :  { %800 = vmatprep.subr.bf16.mxu1 %v1014_v0 }
  0x4b   :  { %817 = vmatpush3.bf16.msra.mxu0 %v910_v19 }
  0x4c   :  { %801 = vmatpush3.bf16.msra.mxu1 %v904_v13  ;;  %818 = vmatprep.subr.bf16.mxu0 %v1014_v0 }
  0x4d   :  { %802 = vmatprep.subr.bf16.mxu1 %v1014_v0 }
  0x4f   :  { %819 = vmatpush3.bf16.msra.mxu0 %v911_v20 }
  0x50   :  { %803 = vmatpush3.bf16.msra.mxu1 %v905_v14  ;;  %820 = vmatprep.subr.bf16.mxu0 %v1014_v0 }
  0x51   :  { %804 = vmatprep.subr.bf16.mxu1 %v1014_v0 }
  0x53   :  { %821 = vmatpush3.bf16.msra.mxu0 %v912_v21 }
  0x54   :  { %805 = vmatpush3.bf16.msra.mxu1 %v906_v15  ;;  %822 = vmatprep.subr.bf16.mxu0 %v1014_v0  ;;  %v937_v15 = vld [vmem:[#allocation6 + $0x130] sm:$0xff]  }
  0x55   :  { %830 = vmatprep.subr.bf16.mxu1 %v1014_v0 }
  0x57   :  { %823 = vmatpush3.bf16.msra.mxu0 %v913_v30 }
  0x58   :  { %824 = vmatprep.subr.bf16.mxu0 %v1014_v0 }
  0x5b   :  { %825 = vmatpush3.bf16.msra.mxu0 %v914_v31 }
  0x5c   :  { %850 = vmatprep.subr.bf16.mxu0 %v1014_v0 }
 0x111   :  { %v116_v23 = vpop.f32.mrb[0].mxu0 }
 0x112   :  { %v117_v24 = vadd.f32 %v689_v22, %v116_v23  ;;  %v788_v25 = vpop.f32.mrb[1].mxu0 }
 0x113   :  { %v119_v26 = vpop.f32.mrb[2].mxu0  ;;  %v728_v25 = vld [vmem:[%s1161_s3 + $0x5] ss:$0 sm:$0xff] }
 0x114   :  { %v122_v27 = vmax.f32 %v117_v24, 0.0  ;;  %v789_v28 = vpop.f32.mrb[3].mxu0 }
 0x116   :  { %v123_v29 = vpack.c.bf16 %v122_v27, %v122_v27 }
 0x118   :  { %807 = vmatmul.mubr.bf16.vlgmr.msra.gmra.mrb[0].mxu1 %v123_v29 }
 0x119   :  { %846 = vmatprep.mubr.msk.bf16.mxu1 %vm1015_vm1, %v1014_v0  ;;  %831 = vmatpush3.bf16.msra.mxu1 %v915_v32 }
 0x11a   :  { %832 = vmatprep.subr.bf16.mxu1 %v1014_v0 }
 0x11d   :  { %833 = vmatpush3.bf16.msra.mxu1 %v916_v33 }
 0x11e   :  { %834 = vmatprep.subr.bf16.mxu1 %v1014_v0 }
 0x121   :  { %835 = vmatpush3.bf16.msra.mxu1 %v917_v34 }
 0x122   :  { %836 = vmatprep.subr.bf16.mxu1 %v1014_v0 }
 0x125   :  { %837 = vmatpush3.bf16.msra.mxu1 %v918_v35 }
 0x126   :  { %838 = vmatprep.subr.bf16.mxu1 %v1014_v0 }
 0x129   :  { %839 = vmatpush3.bf16.msra.mxu1 %v919_v36 }
 0x12a   :  { %840 = vmatprep.subr.bf16.mxu1 %v1014_v0 }
 0x12d   :  { %841 = vmatpush3.bf16.msra.mxu1 %v920_v37 }
 0x12e   :  { %842 = vmatprep.subr.bf16.mxu1 %v1014_v0 }
 0x131   :  { %843 = vmatpush3.bf16.msra.mxu1 %v921_v46 }
 0x132   :  { %844 = vmatprep.subr.bf16.mxu1 %v1014_v0 }
 0x135   :  { %845 = vmatpush3.bf16.msra.mxu1 %v922_v47 }
 0x136   :  { %870 = vmatprep.subr.bf16.mxu1 %v1014_v0 }
 0x1eb   :  { %v227_v39 = vpop.f32.mrb[0].mxu1 }
 0x1ec   :  { %v228_v40 = vadd.f32 %v692_v38, %v227_v39  ;;  %v808_v41 = vpop.f32.mrb[1].mxu1 }
 0x1ed   :  { %v230_v42 = vpop.f32.mrb[2].mxu1 }
 0x1ee   :  { %v233_v43 = vmax.f32 %v228_v40, 0.0  ;;  %v809_v44 = vpop.f32.mrb[3].mxu1 }
 0x1f0   :  { %v234_v45 = vpack.c.bf16 %v233_v43, %v233_v43 }
 0x1f2   :  { %827 = vmatmul.mubr.bf16.vlgmr.msra.gmra.mrb[4].mxu0 %v234_v45 }
 0x1f3   :  { %866 = vmatprep.mubr.msk.bf16.mxu0 %vm1015_vm1, %v1014_v0  ;;  %851 = vmatpush3.bf16.msra.mxu0 %v923_v48 }
 0x1f4   :  { %852 = vmatprep.subr.bf16.mxu0 %v1014_v0 }
 0x1f7   :  { %853 = vmatpush3.bf16.msra.mxu0 %v924_v49 }
 0x1f8   :  { %854 = vmatprep.subr.bf16.mxu0 %v1014_v0 }
 0x1fb   :  { %855 = vmatpush3.bf16.msra.mxu0 %v925_v50 }
 0x1fc   :  { %856 = vmatprep.subr.bf16.mxu0 %v1014_v0 }
 0x1ff   :  { %857 = vmatpush3.bf16.msra.mxu0 %v926_v51 }
 0x200   :  { %858 = vmatprep.subr.bf16.mxu0 %v1014_v0 }
 0x203   :  { %859 = vmatpush3.bf16.msra.mxu0 %v927_v52 }
 0x204   :  { %860 = vmatprep.subr.bf16.mxu0 %v1014_v0 }
 0x207   :  { %861 = vmatpush3.bf16.msra.mxu0 %v928_v53 }
 0x208   :  { %862 = vmatprep.subr.bf16.mxu0 %v1014_v0 }
 0x20b   :  { %863 = vmatpush3.bf16.msra.mxu0 %v929_v62 }
 0x20c   :  { %864 = vmatprep.subr.bf16.mxu0 %v1014_v0 }
 0x20f   :  { %865 = vmatpush3.bf16.msra.mxu0 %v930_v63 }
 0x2c5   :  { %v339_v55 = vpop.f32.mrb[4].mxu0 }
 0x2c6   :  { %v340_v56 = vadd.f32 %v701_v54, %v339_v55  ;;  %v828_v57 = vpop.f32.mrb[5].mxu0 }
 0x2c7   :  { %v342_v58 = vpop.f32.mrb[6].mxu0 }
 0x2c8   :  { %v345_v59 = vmax.f32 %v340_v56, 0.0  ;;  %v829_v60 = vpop.f32.mrb[7].mxu0 }
 0x2ca   :  { %v346_v61 = vpack.c.bf16 %v345_v59, %v345_v59 }
 0x2cc   :  { %847 = vmatmul.mubr.bf16.vlgmr.msra.gmra.mrb[4].mxu1 %v346_v61 }
 0x2cd   :  { %886 = vmatprep.mubr.msk.bf16.mxu1 %vm1015_vm1, %v1014_v0  ;;  %871 = vmatpush3.bf16.msra.mxu1 %v931_v1 }
 0x2ce   :  { %872 = vmatprep.subr.bf16.mxu1 %v1014_v0 }
 0x2d1   :  { %873 = vmatpush3.bf16.msra.mxu1 %v932_v2 }
 0x2d2   :  { %874 = vmatprep.subr.bf16.mxu1 %v1014_v0 }
 0x2d5   :  { %875 = vmatpush3.bf16.msra.mxu1 %v933_v3 }
 0x2d6   :  { %876 = vmatprep.subr.bf16.mxu1 %v1014_v0 }
 0x2d9   :  { %877 = vmatpush3.bf16.msra.mxu1 %v934_v4 }
 0x2da   :  { %878 = vmatprep.subr.bf16.mxu1 %v1014_v0 }
 0x2dd   :  { %879 = vmatpush3.bf16.msra.mxu1 %v935_v5 }
 0x2de   :  { %880 = vmatprep.subr.bf16.mxu1 %v1014_v0 }
 0x2e1   :  { %881 = vmatpush3.bf16.msra.mxu1 %v936_v6 }
 0x2e2   :  { %882 = vmatprep.subr.bf16.mxu1 %v1014_v0 }
 0x2e5   :  { %883 = vmatpush3.bf16.msra.mxu1 %v937_v15 }
 0x2e6   :  { %884 = vmatprep.subr.bf16.mxu1 %v1014_v0 }
 0x2e9   :  { %885 = vmatpush3.bf16.msra.mxu1 %v938_v16 }
 0x39f   :  { %v451_v8 = vpop.f32.mrb[4].mxu1 }
 0x3a0   :  { %v452_v9 = vadd.f32 %v710_v7, %v451_v8  ;;  %v848_v10 = vpop.f32.mrb[5].mxu1 }
 0x3a1   :  { %v454_v11 = vpop.f32.mrb[6].mxu1 }
 0x3a2   :  { %v457_v12 = vmax.f32 %v452_v9, 0.0  ;;  %v849_v13 = vpop.f32.mrb[7].mxu1 }
 0x3a4   :  { %v458_v14 = vpack.c.bf16 %v457_v12, %v457_v12 }
 0x3a6   :  { %867 = vmatmul.mubr.bf16.vlgmr.msra.gmra.mrb[8].mxu0 %v458_v14 }
 0x479   :  { %v563_v18 = vpop.f32.mrb[8].mxu0 }
 0x47a   :  { %v564_v19 = vadd.f32 %v719_v17, %v563_v18  ;;  %v868_v20 = vpop.f32.mrb[9].mxu0 }
 0x47b   :  { %v566_v21 = vpop.f32.mrb[10].mxu0 }
 0x47c   :  { %v569_v22 = vmax.f32 %v564_v19, 0.0  ;;  %v869_v23 = vpop.f32.mrb[11].mxu0 }
 0x47e   :  { %v570_v24 = vpack.c.bf16 %v569_v22, %v569_v22 }
 0x480   :  { %887 = vmatmul.mubr.bf16.vlgmr.msra.gmra.mrb[8].mxu1 %v570_v24 }
 0x553   :  { %v675_v26 = vpop.f32.mrb[8].mxu1 }
 0x554   :  { %v676_v0 = vadd.f32 %v728_v25, %v675_v26  ;;  %v888_v27 = vpop.f32.mrb[9].mxu1 }
 0x555   :  { %v678_v28 = vpop.f32.mrb[10].mxu1 }
 0x556   :  { %682 = vst.msk [vmem:[%s1162_s4] sm:$0xff] %vm681_vm4, %v676_v0  ;;  %v889_v29 = vpop.f32.mrb[11].mxu1 }
 0x557   :  { %687 = vsyncpa [#allocation3], 1 }
 0x558   :  { %688 = vsyncpa [#allocation5], 1 }

</bundles_post_ra>
